<compile_context>
chip_gen: v6e
topology: v6e:2x2x1
jax: 0.10.0
libtpu: 0.0.40
codegen_flags: <defaults>
</compile_context>

<pallas_src>
import jax
import jax.numpy as jnp
from jax.experimental import pallas as pl
from jax.experimental.pallas import tpu as pltpu


# --------------------------------------------------------------------------- #
# Device heuristics
# --------------------------------------------------------------------------- #
def _device_kind():
    try:
        return jax.devices()[0].device_kind.lower()
    except Exception:
        return ""


def _default_weight_dtype(kind=None):
    """bf16 weights on v5e and newer (MXU is natively bf16); f32 on v2/v3/v4."""
    kind = _device_kind() if kind is None else kind
    if any(tag in kind for tag in ("v2", "v3", "v4")):
        return jnp.float32
    return jnp.bfloat16


def _default_act_dtype(kind=None):
    """bf16 activations only where the VPU/EUP have bf16 (v6e/v7x); else f32."""
    kind = _device_kind() if kind is None else kind
    if any(tag in kind for tag in ("v2", "v3", "v4", "v5")):
        return jnp.float32
    return jnp.bfloat16


def _num_tensorcores(kind=None):
    """v7x exposes 2 TensorCores per chip to a single Pallas grid."""
    kind = _device_kind() if kind is None else kind
    return 2 if ("v7" in kind or "7x" in kind) else 1


def _pick_batch_tile(B, num_cores):
    """Batch tile selection.

    1-TC chips (v5e/v6e): one tile per call when B <= ~2048 (extra grid steps
    are pure serial overhead); otherwise the largest multiple-of-8 divisor.
    2-TC chips (v7x): split only when each core gets >= ~256 rows, and make
    the grid even so neither core idles.
    """
    MAX_TILE = 2048
    if B % 8 != 0:
        return B                               # tiny/odd batch: single tile
    if num_cores >= 2 and B >= 512 and (B // 2) % 8 == 0:
        half = B // 2
        tb = 8
        for cand in range(8, min(half, MAX_TILE) + 1, 8):
            if half % cand == 0:
                tb = cand
        return tb                              # grid = B/tb is even
    if B <= MAX_TILE:
        return B                               # single tile, grid = 1
    tb = 8
    for cand in range(8, MAX_TILE + 1, 8):
        if B % cand == 0:
            tb = cand
    return tb


# --------------------------------------------------------------------------- #
# Kernel
# --------------------------------------------------------------------------- #
def _make_kernel(act_dtype):
    """Fused 4-matmul TimeEmbedding kernel.  act_dtype = inter-layer dtype."""

    def silu(v):
        # SiLU = x * sigmoid(x);  sigmoid(x) = 0.5 * (1 + tanh(0.5 x))
        # -> one EUP transcendental per element instead of exp + reciprocal.
        return v * (jnp.tanh(v * 0.5) * 0.5 + 0.5)

    def kernel(x_ref, w1_ref, w2_ref, w34_ref, w5_ref, b_ref, o_ref):
        cdt = w1_ref.dtype                      # MXU operand dtype

        def linear(h, w_ref, row):
            dout = w_ref.shape[1]               # padded -> multiple of 128
            acc = jnp.dot(h.astype(cdt), w_ref[...],
                          preferred_element_type=jnp.float32)
            return acc + b_ref[row:row + 1, 0:dout]      # f32 bias add

        h = silu(linear(x_ref[...], w1_ref, 0).astype(act_dtype))  # L1 + SiLU
        h = silu(linear(h, w2_ref, 1).astype(act_dtype))           # L2 + SiLU
        h = silu(linear(h, w34_ref, 2).astype(act_dtype))          # L3*L4 + SiLU
        o_ref[...] = linear(h, w5_ref, 3).astype(o_ref.dtype)      # L5

    return kernel


# --------------------------------------------------------------------------- #
# Host-side parameter preparation (call ONCE at init, not per forward)
# --------------------------------------------------------------------------- #
def _round_up(x, m):
    return ((x + m - 1) // m) * m


def prepare_params(params, *, weight_dtype=None, act_dtype=None):
    """Fold L3@L4 (f32), zero-pad every layer width to a 128-lane multiple,
    cast weights to the MXU dtype, pack the 4 biases into one f32 block.

    params: list of 5 (W [in,out], b [out]) pairs (W stored transposed vs torch).
    """
    kind = _device_kind()
    if weight_dtype is None:
        weight_dtype = _default_weight_dtype(kind)
    if act_dtype is None:
        act_dtype = _default_act_dtype(kind)

    (w1, b1), (w2, b2), (w3, b3), (w4, b4), (w5, b5) = params
    n_out = int(w5.shape[1])

    # Fold Linear3 -> Linear4 (no activation between them), in f32.
    w3f, w4f = w3.astype(jnp.float32), w4.astype(jnp.float32)
    w34 = w3f @ w4f                                            # [2n, n]
    b34 = b3.astype(jnp.float32) @ w4f + b4.astype(jnp.float32)

    ws = [w1.astype(jnp.float32), w2.astype(jnp.float32), w34,
          w5.astype(jnp.float32)]
    bs = [b1.astype(jnp.float32), b2.astype(jnp.float32), b34,
          b5.astype(jnp.float32)]

    # Zero-pad each output dim (and the next layer's input dim) to 128 lanes.
    # Padded columns are exactly zero pre- and post-SiLU, and zero input rows
    # contribute nothing on the MXU, so the padding is numerically exact.
    padded_ws, padded_bs = [], []
    prev_out_pad = int(ws[0].shape[0])          # x's feature dim is not padded
    for w, b in zip(ws, bs):
        din, dout = int(w.shape[0]), int(w.shape[1])
        dout_pad = _round_up(dout, 128)
        w = jnp.pad(w, ((0, prev_out_pad - din), (0, dout_pad - dout)))
        b = jnp.pad(b, (0, dout_pad - dout))
        padded_ws.append(w)
        padded_bs.append(b)
        prev_out_pad = dout_pad

    max_w = max(int(b.shape[0]) for b in padded_bs)
    b_cat = jnp.stack([jnp.pad(b, (0, max_w - b.shape[0])) for b in padded_bs])

    ws_dev = tuple(w.astype(weight_dtype) for w in padded_ws)
    return ws_dev, b_cat, n_out, act_dtype


# --------------------------------------------------------------------------- #
# Wrapper
# --------------------------------------------------------------------------- #
def time_embedding(x, prepared, *, batch_tile=None):
    """x: [B, t_emb_dim]; prepared = prepare_params(params) (made once)."""
    ws, b_cat, n_out, act_dtype = prepared
    B, t_dim = x.shape
    n_pad = int(ws[-1].shape[1])

    tb = _pick_batch_tile(B, _num_tensorcores()) if batch_tile is None else batch_tile
    assert B % tb == 0, (B, tb)

    in_specs = [pl.BlockSpec((tb, t_dim), lambda i: (i, 0))]
    for w in ws:
        # Constant block index -> weight stays resident across grid steps.
        in_specs.append(pl.BlockSpec(w.shape, lambda i: (0, 0)))
    in_specs.append(pl.BlockSpec(b_cat.shape, lambda i: (0, 0)))

    out_padded = pl.pallas_call(
        _make_kernel(act_dtype),
        out_shape=jax.ShapeDtypeStruct((B, n_pad), x.dtype),
        grid_spec=pltpu.PrefetchScalarGridSpec(
            num_scalar_prefetch=0,
            grid=(B // tb,),
            in_specs=in_specs,
            out_specs=pl.BlockSpec((tb, n_pad), lambda i: (i, 0)),
        ),
        compiler_params=pltpu.CompilerParams(
            dimension_semantics=("parallel",),
        ),
    )(x, *ws, b_cat)

    return out_padded[:, :n_out] if n_pad != n_out else out_padded


# --------------------------------------------------------------------------- #
# Params / reference / test
# --------------------------------------------------------------------------- #
def init_params(key, t_emb_dim, n_out):
    """Deterministic parameter init. W stored as [in, out] (torch W.T)."""
    dims = [
        (t_emb_dim, n_out * 4),   # te_block Linear 1
        (n_out * 4, n_out * 2),   # te_block Linear 2
        (n_out * 2, n_out),       # te_block Linear 3
        (n_out, n_out),           # modulation Linear 1
        (n_out, n_out),           # modulation Linear 2
    ]
    params = []
    for (din, dout) in dims:
        key, kw, kb = jax.random.split(key, 3)
        scale = 1.0 / jnp.sqrt(din)
        w = jax.random.uniform(kw, (din, dout), jnp.float32, -scale, scale)
        b = jax.random.uniform(kb, (dout,), jnp.float32, -scale, scale)
        params.append((w, b))
    return params


def reference(x, params):
    """Pure f32 mirror of the PyTorch module forward."""
    def silu(v):
        return v * jax.nn.sigmoid(v)
    h = silu(x @ params[0][0] + params[0][1])
    h = silu(h @ params[1][0] + params[1][1])
    te = h @ params[2][0] + params[2][1]
    m = silu(te @ params[3][0] + params[3][1])
    return m @ params[4][0] + params[4][1]


if __name__ == "__main__":
    key = jax.random.PRNGKey(0)
    B, t_emb_dim, n_out = 8, 128, 32

    kx, kp = jax.random.split(key)
    x = jax.random.normal(kx, (B, t_emb_dim), jnp.float32)
    params = init_params(kp, t_emb_dim, n_out)

    # One-time host-side prep (fold, pad, cast, bias pack) -- NOT per call.
    prepared = prepare_params(params)

    fwd = jax.jit(lambda xx: time_embedding(xx, prepared))
    out = jax.block_until_ready(fwd(x))
    ref = reference(x, params)

    # bf16 weight/activation path on modern chips needs bf16-level tolerance
    # vs the f32 reference; pure-f32 path only differs by the W3*W4 fold.
    tol = 5e-2 if prepared[0][0].dtype == jnp.bfloat16 else 2e-3

    assert out.shape == (B, n_out), out.shape
    assert jnp.allclose(out, ref, atol=tol, rtol=tol), float(
        jnp.max(jnp.abs(out - ref))
    )
    print("KERNEL_OK")
</pallas_src>

<mosaic_0001>
module attributes {stable_mosaic.version = 11 : i64} {
  func.func @kernel(%arg0: i32, %arg1: memref<8x128xf32, #tpu.memory_space<vmem>>, %arg2: memref<128x128xbf16, #tpu.memory_space<vmem>>, %arg3: memref<128x128xbf16, #tpu.memory_space<vmem>>, %arg4: memref<128x128xbf16, #tpu.memory_space<vmem>>, %arg5: memref<128x128xbf16, #tpu.memory_space<vmem>>, %arg6: memref<4x128xf32, #tpu.memory_space<vmem>>, %arg7: memref<8x128xf32, #tpu.memory_space<vmem>>) attributes {dimension_semantics = [#tpu.dimension_semantics<parallel>], iteration_bounds = array<i64: 1>, scalar_prefetch = 0 : i64, scratch_operands = 0 : i64, tpu.core_type = #tpu.core_type<tc>, window_params = [{transform_indices = @transform_0, window_bounds = array<i64: 8, 128>}, {pipeline_mode = #tpu.pipeline_mode<synchronous>, transform_indices = @transform_1, window_bounds = array<i64: 128, 128>}, {pipeline_mode = #tpu.pipeline_mode<synchronous>, transform_indices = @transform_2, window_bounds = array<i64: 128, 128>}, {pipeline_mode = #tpu.pipeline_mode<synchronous>, transform_indices = @transform_3, window_bounds = array<i64: 128, 128>}, {pipeline_mode = #tpu.pipeline_mode<synchronous>, transform_indices = @transform_4, window_bounds = array<i64: 128, 128>}, {pipeline_mode = #tpu.pipeline_mode<synchronous>, transform_indices = @transform_5, window_bounds = array<i64: 4, 128>}, {transform_indices = @transform_6, window_bounds = array<i64: 8, 128>}]} {
    %c0 = arith.constant 0 : index
    %c0_0 = arith.constant 0 : index
    %0 = vector.load %arg1[%c0, %c0_0] : memref<8x128xf32, #tpu.memory_space<vmem>>, vector<8x128xf32>
    %1 = arith.truncf %0 : vector<8x128xf32> to vector<8x128xbf16>
    %c0_1 = arith.constant 0 : index
    %c0_2 = arith.constant 0 : index
    %2 = vector.load %arg2[%c0_1, %c0_2] : memref<128x128xbf16, #tpu.memory_space<vmem>>, vector<128x128xbf16>
    %cst = arith.constant dense<0.000000e+00> : vector<8x128xf32>
    %3 = tpu.matmul %1, %2, %cst {dimension_numbers = #tpu.dot_dimension_numbers<[1], [0], [0], [1], [0, 0, 1, 1], [], []>} : vector<8x128xbf16>, vector<128x128xbf16>, vector<8x128xf32> -> vector<8x128xf32>
    %c0_3 = arith.constant 0 : index
    %c0_4 = arith.constant 0 : index
    %4 = vector.load %arg6[%c0_3, %c0_4] : memref<4x128xf32, #tpu.memory_space<vmem>>, vector<1x128xf32>
    %5 = vector.broadcast %4 : vector<1x128xf32> to vector<8x128xf32>
    %6 = arith.addf %3, %5 : vector<8x128xf32>
    %7 = arith.truncf %6 : vector<8x128xf32> to vector<8x128xbf16>
    %cst_5 = arith.constant 5.000000e-01 : bf16
    %8 = vector.broadcast %cst_5 : bf16 to vector<8x128xbf16>
    %9 = arith.mulf %7, %8 : vector<8x128xbf16>
    %10 = math.tanh %9 : vector<8x128xbf16>
    %cst_6 = arith.constant 5.000000e-01 : bf16
    %11 = vector.broadcast %cst_6 : bf16 to vector<8x128xbf16>
    %12 = arith.mulf %10, %11 : vector<8x128xbf16>
    %cst_7 = arith.constant 5.000000e-01 : bf16
    %13 = vector.broadcast %cst_7 : bf16 to vector<8x128xbf16>
    %14 = arith.addf %12, %13 : vector<8x128xbf16>
    %15 = arith.mulf %7, %14 : vector<8x128xbf16>
    %c0_8 = arith.constant 0 : index
    %c0_9 = arith.constant 0 : index
    %16 = vector.load %arg3[%c0_8, %c0_9] : memref<128x128xbf16, #tpu.memory_space<vmem>>, vector<128x128xbf16>
    %cst_10 = arith.constant dense<0.000000e+00> : vector<8x128xf32>
    %17 = tpu.matmul %15, %16, %cst_10 {dimension_numbers = #tpu.dot_dimension_numbers<[1], [0], [0], [1], [0, 0, 1, 1], [], []>} : vector<8x128xbf16>, vector<128x128xbf16>, vector<8x128xf32> -> vector<8x128xf32>
    %c1 = arith.constant 1 : index
    %c0_11 = arith.constant 0 : index
    %18 = vector.load %arg6[%c1, %c0_11] : memref<4x128xf32, #tpu.memory_space<vmem>>, vector<1x128xf32>
    %19 = vector.broadcast %18 : vector<1x128xf32> to vector<8x128xf32>
    %20 = arith.addf %17, %19 : vector<8x128xf32>
    %21 = arith.truncf %20 : vector<8x128xf32> to vector<8x128xbf16>
    %cst_12 = arith.constant 5.000000e-01 : bf16
    %22 = vector.broadcast %cst_12 : bf16 to vector<8x128xbf16>
    %23 = arith.mulf %21, %22 : vector<8x128xbf16>
    %24 = math.tanh %23 : vector<8x128xbf16>
    %cst_13 = arith.constant 5.000000e-01 : bf16
    %25 = vector.broadcast %cst_13 : bf16 to vector<8x128xbf16>
    %26 = arith.mulf %24, %25 : vector<8x128xbf16>
    %cst_14 = arith.constant 5.000000e-01 : bf16
    %27 = vector.broadcast %cst_14 : bf16 to vector<8x128xbf16>
    %28 = arith.addf %26, %27 : vector<8x128xbf16>
    %29 = arith.mulf %21, %28 : vector<8x128xbf16>
    %c0_15 = arith.constant 0 : index
    %c0_16 = arith.constant 0 : index
    %30 = vector.load %arg4[%c0_15, %c0_16] : memref<128x128xbf16, #tpu.memory_space<vmem>>, vector<128x128xbf16>
    %cst_17 = arith.constant dense<0.000000e+00> : vector<8x128xf32>
    %31 = tpu.matmul %29, %30, %cst_17 {dimension_numbers = #tpu.dot_dimension_numbers<[1], [0], [0], [1], [0, 0, 1, 1], [], []>} : vector<8x128xbf16>, vector<128x128xbf16>, vector<8x128xf32> -> vector<8x128xf32>
    %c2 = arith.constant 2 : index
    %c0_18 = arith.constant 0 : index
    %32 = vector.load %arg6[%c2, %c0_18] : memref<4x128xf32, #tpu.memory_space<vmem>>, vector<1x128xf32>
    %33 = vector.broadcast %32 : vector<1x128xf32> to vector<8x128xf32>
    %34 = arith.addf %31, %33 : vector<8x128xf32>
    %35 = arith.truncf %34 : vector<8x128xf32> to vector<8x128xbf16>
    %cst_19 = arith.constant 5.000000e-01 : bf16
    %36 = vector.broadcast %cst_19 : bf16 to vector<8x128xbf16>
    %37 = arith.mulf %35, %36 : vector<8x128xbf16>
    %38 = math.tanh %37 : vector<8x128xbf16>
    %cst_20 = arith.constant 5.000000e-01 : bf16
    %39 = vector.broadcast %cst_20 : bf16 to vector<8x128xbf16>
    %40 = arith.mulf %38, %39 : vector<8x128xbf16>
    %cst_21 = arith.constant 5.000000e-01 : bf16
    %41 = vector.broadcast %cst_21 : bf16 to vector<8x128xbf16>
    %42 = arith.addf %40, %41 : vector<8x128xbf16>
    %43 = arith.mulf %35, %42 : vector<8x128xbf16>
    %c0_22 = arith.constant 0 : index
    %c0_23 = arith.constant 0 : index
    %44 = vector.load %arg5[%c0_22, %c0_23] : memref<128x128xbf16, #tpu.memory_space<vmem>>, vector<128x128xbf16>
    %cst_24 = arith.constant dense<0.000000e+00> : vector<8x128xf32>
    %45 = tpu.matmul %43, %44, %cst_24 {dimension_numbers = #tpu.dot_dimension_numbers<[1], [0], [0], [1], [0, 0, 1, 1], [], []>} : vector<8x128xbf16>, vector<128x128xbf16>, vector<8x128xf32> -> vector<8x128xf32>
    %c3 = arith.constant 3 : index
    %c0_25 = arith.constant 0 : index
    %46 = vector.load %arg6[%c3, %c0_25] : memref<4x128xf32, #tpu.memory_space<vmem>>, vector<1x128xf32>
    %47 = vector.broadcast %46 : vector<1x128xf32> to vector<8x128xf32>
    %48 = arith.addf %45, %47 : vector<8x128xf32>
    %c0_26 = arith.constant 0 : index
    %c0_27 = arith.constant 0 : index
    %49 = vector.load %arg7[%c0_26, %c0_27] : memref<8x128xf32, #tpu.memory_space<vmem>>, vector<8x128xf32>
    tpu.vector_store %arg7[%c0_26, %c0_27], %48 {strides = array<i32>} : memref<8x128xf32, #tpu.memory_space<vmem>>, vector<8x128xf32>,
    return
  }
  func.func @transform_0(%arg0: i32) -> (i32, i32) {
    %c0_i32 = arith.constant 0 : i32
    %c0_i32_0 = arith.constant 0 : i32
    return %arg0, %c0_i32 : i32, i32
  }
  func.func @transform_1(%arg0: i32) -> (i32, i32) {
    %c0_i32 = arith.constant 0 : i32
    %c0_i32_0 = arith.constant 0 : i32
    %c0_i32_1 = arith.constant 0 : i32
    return %c0_i32, %c0_i32_0 : i32, i32
  }
  func.func @transform_2(%arg0: i32) -> (i32, i32) {
    %c0_i32 = arith.constant 0 : i32
    %c0_i32_0 = arith.constant 0 : i32
    %c0_i32_1 = arith.constant 0 : i32
    return %c0_i32, %c0_i32_0 : i32, i32
  }
  func.func @transform_3(%arg0: i32) -> (i32, i32) {
    %c0_i32 = arith.constant 0 : i32
    %c0_i32_0 = arith.constant 0 : i32
    %c0_i32_1 = arith.constant 0 : i32
    return %c0_i32, %c0_i32_0 : i32, i32
  }
  func.func @transform_4(%arg0: i32) -> (i32, i32) {
    %c0_i32 = arith.constant 0 : i32
    %c0_i32_0 = arith.constant 0 : i32
    %c0_i32_1 = arith.constant 0 : i32
    return %c0_i32, %c0_i32_0 : i32, i32
  }
  func.func @transform_5(%arg0: i32) -> (i32, i32) {
    %c0_i32 = arith.constant 0 : i32
    %c0_i32_0 = arith.constant 0 : i32
    %c0_i32_1 = arith.constant 0 : i32
    return %c0_i32, %c0_i32_0 : i32, i32
  }
  func.func @transform_6(%arg0: i32) -> (i32, i32) {
    %c0_i32 = arith.constant 0 : i32
    %c0_i32_0 = arith.constant 0 : i32
    return %arg0, %c0_i32 : i32, i32
  }
}

</mosaic_0001>

<bundles_post_ra>
// kernel: _lambda_.1
= control target key start
LH: loop header
LB: loop body
LE: loop exit
PB: predicated region body
PF: predicated region fallthrough
CT: control target
= control target key end

     0   :  { %11 = vsyncpa [#allocation3], 0  ;;  %s1021_s0 = inlined_call_operand.hbm [shape: f32[8,128], index: 0, kind: input, shape index: {}]   ;;  %s1022_s1 = inlined_call_operand.hbm [shape: bf16[128,128], index: 1, kind: input, shape index: {}]   ;;  %s1023_s2 = inlined_call_operand.hbm [shape: bf16[128,128], index: 2, kind: input, shape index: {}]   ;;  %s1024_s3 = inlined_call_operand.hbm [shape: bf16[128,128], index: 3, kind: input, shape index: {}]   ;;  %s1025_s4 = inlined_call_operand.hbm [shape: bf16[128,128], index: 4, kind: input, shape index: {}]   ;;  %s1026_s5 = inlined_call_operand.vmem [shape: f32[4,128], index: 5, kind: input, shape index: {}]   ;;  %s1027_s6 = inlined_call_operand.hbm [shape: f32[8,128], index: 6, kind: output, shape index: {}]  }
   0x1   :  { %12 = vsyncpa [#allocation6], 0 }
   0x2   :  { %13 = vsyncpa [#allocation9], 0 }
   0x3   :  { %14 = vsyncpa [#allocation4], 0  ;;  %s894_s21 = smov [#allocation5]  }
   0x4   :  { %s30_s22 = sshll.u32 %s894_s21, 4  ;;  %s31_s22 = int_to_ptr.vmem [resolvable:$true] %s30_s22 }
   0x5   :  { %s774_s23 = scalar_lea.vmem %s31_s22, 1024  ;;  %p779_p1 = scmp.lt.s32.totalorder %s31_s22, %s31_s22 }
   0x6   :  { %p775_p0 = scmp.ne.s32.totalorder %s31_s22, %s774_s23  ;;  %p780_p2 = scmp.lt.s32.totalorder %s774_s23, %s774_s23 }
   0x8   :  { %p781_p3 = por %p780_p2, %p779_p1 }
   0xa   :  { %p782_p4 = pnand %p781_p3, %p775_p0 }
   0xc   :  { %785 = shalt.err (!%p782_p4)
}
   0xd   :  { %s895_s24 = smov 64   ;;  %s896_s25 = smov 4  }
   0xe   :  { %36 = dma.hbm_to_vmem [thread:$0]  %s1022_s1, 1024, %s31_s22, [#allocation6], %s895_s24, %s895_s24, %s896_s25  }
   0xf   :  { %s897_s28 = smov [#allocation8]   ;;  %s898_s30 = smov [#allocation2]  }
  0x10   :  { %s54_s29 = sshll.u32 %s897_s28, 4  ;;  %s21_s7 = sshll.u32 %s898_s30, 4  ;;  %s55_s29 = int_to_ptr.vmem [resolvable:$true] %s54_s29  ;;  %s22_s7 = int_to_ptr.vmem [resolvable:$true] %s21_s7 }
  0x11   :  { %s794_s8 = scalar_lea.vmem %s55_s29, 1024  ;;  %p799_p6 = scmp.lt.s32.totalorder %s55_s29, %s55_s29 }
  0x12   :  { %p795_p5 = scmp.ne.s32.totalorder %s55_s29, %s794_s8  ;;  %p800_p7 = scmp.lt.s32.totalorder %s794_s8, %s794_s8 }
  0x14   :  { %p801_p8 = por %p800_p7, %p799_p6 }
  0x16   :  { %p802_p9 = pnand %p801_p8, %p795_p5 }
  0x18   :  { %805 = shalt.err (!%p802_p9)
}
  0x19   :  { %60 = dma.hbm_to_vmem [thread:$0]  %s1024_s3, 1024, %s55_s29, [#allocation9], %s895_s24, %s895_s24, %s896_s25  }
  0x1a   :  { %s814_s1 = scalar_lea.vmem %s22_s7, 128  ;;  %p819_p11 = scmp.lt.s32.totalorder %s22_s7, %s22_s7 }
  0x1b   :  { %p815_p10 = scmp.ne.s32.totalorder %s22_s7, %s814_s1  ;;  %p820_p12 = scmp.lt.s32.totalorder %s814_s1, %s814_s1 }
  0x1d   :  { %p821_p13 = por %p820_p12, %p819_p11 }
  0x1f   :  { %p822_p0 = pnand %p821_p13, %p815_p10 }
  0x21   :  { %825 = shalt.err (!%p822_p0)
}
  0x22   :  { %24 = dma.hbm_to_vmem [thread:$0]  %s1021_s0, 128, %s22_s7, [#allocation3]  }
  0x23   :  { %s899_s13 = smov [#allocation7]   ;;  %s900_s15 = smov [#allocation10]  }
  0x24   :  { %s42_s14 = sshll.u32 %s899_s13, 4  ;;  %s66_s16 = sshll.u32 %s900_s15, 4  ;;  %s43_s14 = int_to_ptr.vmem [resolvable:$true] %s42_s14  ;;  %s67_s16 = int_to_ptr.vmem [resolvable:$true] %s66_s16 }
  0x25   :  { %s834_s17 = scalar_lea.vmem %s43_s14, 1024  ;;  %p839_p2 = scmp.lt.s32.totalorder %s43_s14, %s43_s14 }
  0x26   :  { %p835_p1 = scmp.ne.s32.totalorder %s43_s14, %s834_s17  ;;  %p840_p3 = scmp.lt.s32.totalorder %s834_s17, %s834_s17 }
  0x28   :  { %p841_p4 = por %p840_p3, %p839_p2 }
  0x2a   :  { %p842_p5 = pnand %p841_p4, %p835_p1 }
  0x2c   :  { %845 = shalt.err (!%p842_p5)
}
  0x2d   :  { %48 = dma.hbm_to_vmem [thread:$0]  %s1023_s2, 1024, %s43_s14, [#allocation6], %s895_s24, %s895_s24, %s896_s25  }
  0x2e   :  { %s854_s0 = scalar_lea.vmem %s67_s16, 1024  ;;  %p859_p7 = scmp.lt.s32.totalorder %s67_s16, %s67_s16 }
  0x2f   :  { %p855_p6 = scmp.ne.s32.totalorder %s67_s16, %s854_s0  ;;  %p860_p8 = scmp.lt.s32.totalorder %s854_s0, %s854_s0 }
  0x31   :  { %p861_p9 = por %p860_p8, %p859_p7 }
  0x33   :  { %p862_p10 = pnand %p861_p9, %p855_p6 }
  0x35   :  { %865 = shalt.err (!%p862_p10)
}
  0x36   :  { %72 = dma.hbm_to_vmem [thread:$0]  %s1025_s4, 1024, %s67_s16, [#allocation9], %s895_s24, %s895_s24, %s896_s25  }
  0x37   :  { %886 = dma.done.wait [#allocation3], 128  }
  0x38   :  { %887 = vsyncadd [#allocation3], 4294967168 }
  0x39   :  { %888 = dma.done.wait [#allocation6], 2048  }
  0x3a   :  { %889 = vsyncadd [#allocation6], 4294965248 }
  0x3b   :  { %890 = dma.done.wait [#allocation9], 2048  }
  0x3c   :  { %891 = vsyncadd [#allocation9], 4294965248  ;;  %v901_v0 = vmov 0.0   ;;  %vm902_vm0 = vmmov 0   ;;  %v728_v1 = vld [vmem:[#allocation5 + $0x38] sm:$0xff]   ;;  %v729_v2 = vld [vmem:[#allocation5 + $0x30] sm:$0xff]  }
  0x3d   :  { %638 = vmatprep.subr.bf16.mxu0 %v901_v0  ;;  %654 = vmatprep.mubr.msk.bf16.mxu0 %vm902_vm0, %v901_v0  ;;  %v730_v3 = vld [vmem:[#allocation5 + $0x28] sm:$0xff]   ;;  %v731_v4 = vld [vmem:[#allocation5 + $0x20] sm:$0xff]   ;;  %v736_v5 = vld [vmem:[#allocation7 + $0x38] sm:$0xff]   ;;  %s903_s27 = smov [#allocation11]  }
  0x3e   :  { %658 = vmatprep.subr.bf16.mxu1 %v901_v0  ;;  %674 = vmatprep.mubr.msk.bf16.mxu1 %vm902_vm0, %v901_v0  ;;  %v732_v6 = vld [vmem:[#allocation5 + $0x18] sm:$0xff]   ;;  %v733_v7 = vld [vmem:[#allocation5 + $0x10] sm:$0xff]   ;;  %v734_v8 = vld [vmem:[#allocation5 + $0x8] sm:$0xff]   ;;  %s555_s28 = sshll.u32 %s903_s27, 4  ;;  %s556_s28 = int_to_ptr.vmem [resolvable:$true] %s555_s28 }
  0x3f   :  { %639 = vmatpush3.bf16.msra.mxu0 %v728_v1  ;;  %659 = vmatpush3.bf16.msra.mxu1 %v736_v5  ;;  %v735_v9 = vld [vmem:[#allocation5] sm:$0xff]   ;;  %v92_v10 = vld [vmem:[#allocation2] sm:$0xff]  ;;  %v737_v12 = vld [vmem:[#allocation7 + $0x30] sm:$0xff]   ;;  %s866_s29 = scalar_lea.vmem %s556_s28, 128  ;;  %p871_p12 = scmp.lt.s32.totalorder %s556_s28, %s556_s28 }
  0x40   :  { %640 = vmatprep.subr.bf16.mxu0 %v901_v0  ;;  %660 = vmatprep.subr.bf16.mxu1 %v901_v0  ;;  %v93_v11 = vpack.c.bf16 %v92_v10, %v92_v10  ;;  %v738_v13 = vld [vmem:[#allocation7 + $0x28] sm:$0xff]   ;;  %v739_v14 = vld [vmem:[#allocation7 + $0x20] sm:$0xff]   ;;  %v740_v15 = vld [vmem:[#allocation7 + $0x18] sm:$0xff]   ;;  %p867_p11 = scmp.ne.s32.totalorder %s556_s28, %s866_s29  ;;  %p872_p13 = scmp.lt.s32.totalorder %s866_s29, %s866_s29 }
  0x41   :  { %v741_v16 = vld [vmem:[#allocation7 + $0x10] sm:$0xff]   ;;  %v742_v17 = vld [vmem:[#allocation7 + $0x8] sm:$0xff]   ;;  %v743_v18 = vld [vmem:[#allocation7] sm:$0xff]  }
  0x42   :  { %v744_v19 = vld [vmem:[#allocation8 + $0x38] sm:$0xff]   ;;  %v745_v32 = vld [vmem:[#allocation8 + $0x30] sm:$0xff]   ;;  %v746_v33 = vld [vmem:[#allocation8 + $0x28] sm:$0xff]   ;;  %p873_p0 = por %p872_p13, %p871_p12 }
  0x43   :  { %641 = vmatpush3.bf16.msra.mxu0 %v729_v2  ;;  %661 = vmatpush3.bf16.msra.mxu1 %v737_v12  ;;  %v566_v20 = vld [vmem:[%s1026_s5] ss:$0 sm:$0xff]  ;;  %v747_v34 = vld [vmem:[#allocation8 + $0x20] sm:$0xff]   ;;  %v749_v36 = vld [vmem:[#allocation8 + $0x10] sm:$0xff]  }
  0x44   :  { %642 = vmatprep.subr.bf16.mxu0 %v901_v0  ;;  %662 = vmatprep.subr.bf16.mxu1 %v901_v0  ;;  %v748_v35 = vld [vmem:[#allocation8 + $0x18] sm:$0xff]   ;;  %v750_v37 = vld [vmem:[#allocation8 + $0x8] sm:$0xff]   ;;  %v751_v38 = vld [vmem:[#allocation8] sm:$0xff]   ;;  %p874_p1 = pnand %p873_p0, %p867_p11 }
  0x45   :  { %v752_v39 = vld [vmem:[#allocation10 + $0x38] sm:$0xff]   ;;  %v753_v52 = vld [vmem:[#allocation10 + $0x30] sm:$0xff]   ;;  %v754_v53 = vld [vmem:[#allocation10 + $0x28] sm:$0xff]  }
  0x46   :  { %v575_v40 = vld [vmem:[%s1026_s5 + $0x1] ss:$0 sm:$0xff]  ;;  %v755_v54 = vld [vmem:[#allocation10 + $0x20] sm:$0xff]   ;;  %v757_v56 = vld [vmem:[#allocation10 + $0x10] sm:$0xff]  }
  0x47   :  { %643 = vmatpush3.bf16.msra.mxu0 %v730_v3  ;;  %663 = vmatpush3.bf16.msra.mxu1 %v738_v13  ;;  %v756_v55 = vld [vmem:[#allocation10 + $0x18] sm:$0xff]   ;;  %v758_v57 = vld [vmem:[#allocation10 + $0x8] sm:$0xff]   ;;  %v759_v58 = vld [vmem:[#allocation10] sm:$0xff]  }
  0x48   :  { %644 = vmatprep.subr.bf16.mxu0 %v901_v0  ;;  %664 = vmatprep.subr.bf16.mxu1 %v901_v0  ;;  %v584_v59 = vld [vmem:[%s1026_s5 + $0x2] ss:$0 sm:$0xff] }
  0x4b   :  { %645 = vmatpush3.bf16.msra.mxu0 %v731_v4  ;;  %665 = vmatpush3.bf16.msra.mxu1 %v739_v14 }
  0x4c   :  { %646 = vmatprep.subr.bf16.mxu0 %v901_v0  ;;  %666 = vmatprep.subr.bf16.mxu1 %v901_v0 }
  0x4f   :  { %647 = vmatpush3.bf16.msra.mxu0 %v732_v6  ;;  %667 = vmatpush3.bf16.msra.mxu1 %v740_v15 }
  0x50   :  { %648 = vmatprep.subr.bf16.mxu0 %v901_v0  ;;  %668 = vmatprep.subr.bf16.mxu1 %v901_v0 }
  0x53   :  { %649 = vmatpush3.bf16.msra.mxu0 %v733_v7  ;;  %669 = vmatpush3.bf16.msra.mxu1 %v741_v16 }
  0x54   :  { %650 = vmatprep.subr.bf16.mxu0 %v901_v0  ;;  %670 = vmatprep.subr.bf16.mxu1 %v901_v0 }
  0x57   :  { %651 = vmatpush3.bf16.msra.mxu0 %v734_v8  ;;  %671 = vmatpush3.bf16.msra.mxu1 %v742_v17 }
  0x58   :  { %652 = vmatprep.subr.bf16.mxu0 %v901_v0  ;;  %672 = vmatprep.subr.bf16.mxu1 %v901_v0 }
  0x5b   :  { %653 = vmatpush3.bf16.msra.mxu0 %v735_v9  ;;  %673 = vmatpush3.bf16.msra.mxu1 %v743_v18 }
  0x5c   :  { %678 = vmatprep.subr.bf16.mxu0 %v901_v0  ;;  %698 = vmatprep.subr.bf16.mxu1 %v901_v0 }
  0x5e   :  { %655 = vmatmul.mubr.bf16.vlgmr.msra.gmra.mxu0 %v93_v11 }
  0x5f   :  { %694 = vmatprep.mubr.msk.bf16.mxu0 %vm902_vm0, %v901_v0  ;;  %679 = vmatpush3.bf16.msra.mxu0 %v744_v19 }
  0x60   :  { %680 = vmatprep.subr.bf16.mxu0 %v901_v0 }
  0x63   :  { %681 = vmatpush3.bf16.msra.mxu0 %v745_v32 }
  0x64   :  { %682 = vmatprep.subr.bf16.mxu0 %v901_v0 }
  0x67   :  { %683 = vmatpush3.bf16.msra.mxu0 %v746_v33 }
  0x68   :  { %684 = vmatprep.subr.bf16.mxu0 %v901_v0 }
  0x6b   :  { %685 = vmatpush3.bf16.msra.mxu0 %v747_v34 }
  0x6c   :  { %686 = vmatprep.subr.bf16.mxu0 %v901_v0 }
  0x6f   :  { %687 = vmatpush3.bf16.msra.mxu0 %v748_v35 }
  0x70   :  { %688 = vmatprep.subr.bf16.mxu0 %v901_v0 }
  0x73   :  { %689 = vmatpush3.bf16.msra.mxu0 %v749_v36 }
  0x74   :  { %690 = vmatprep.subr.bf16.mxu0 %v901_v0 }
  0x77   :  { %691 = vmatpush3.bf16.msra.mxu0 %v750_v37 }
  0x78   :  { %692 = vmatprep.subr.bf16.mxu0 %v901_v0 }
  0x7b   :  { %693 = vmatpush3.bf16.msra.mxu0 %v751_v38 }
 0x11e   :  { %v197_v21 = vpop.f32.mrf.mxu0 }
 0x11f   :  { %v198_v22 = vadd.f32 %v566_v20, %v197_v21 }
 0x120   :  { %v656_v23 = vpop.f32.mrf.mxu0 }
 0x121   :  { %v203_v24 = vpack.c.bf16 %v198_v22, %v198_v22 }
 0x122   :  { %v200_v25 = vpop.f32.mrf.mxu0 }
 0x123   :  { %v204_v26 = vmul.bf16 1056980736, %v203_v24 }
 0x124   :  { %v657_v27 = vpop.f32.mrf.mxu0 }
 0x125   :  { %760 = vtanh.bf16 %v204_v26 }
 0x133   :  { %v761_v28 = vpop.eup %760 }
 0x134   :  { %v206_v29 = vmul.bf16 1056980736, %v761_v28 }
 0x136   :  { %v207_v30 = vadd.bf16 1056980736, %v206_v29 }
 0x138   :  { %v208_v31 = vmul.bf16 %v207_v30, %v203_v24 }
 0x13a   :  { %675 = vmatmul.mubr.bf16.vlgmr.msra.gmra.mxu1 %v208_v31 }
 0x13b   :  { %714 = vmatprep.mubr.msk.bf16.mxu1 %vm902_vm0, %v901_v0  ;;  %699 = vmatpush3.bf16.msra.mxu1 %v752_v39 }
 0x13c   :  { %700 = vmatprep.subr.bf16.mxu1 %v901_v0 }
 0x13f   :  { %701 = vmatpush3.bf16.msra.mxu1 %v753_v52 }
 0x140   :  { %702 = vmatprep.subr.bf16.mxu1 %v901_v0 }
 0x143   :  { %703 = vmatpush3.bf16.msra.mxu1 %v754_v53 }
 0x144   :  { %704 = vmatprep.subr.bf16.mxu1 %v901_v0 }
 0x147   :  { %705 = vmatpush3.bf16.msra.mxu1 %v755_v54 }
 0x148   :  { %706 = vmatprep.subr.bf16.mxu1 %v901_v0 }
 0x14b   :  { %707 = vmatpush3.bf16.msra.mxu1 %v756_v55 }
 0x14c   :  { %708 = vmatprep.subr.bf16.mxu1 %v901_v0 }
 0x14f   :  { %709 = vmatpush3.bf16.msra.mxu1 %v757_v56 }
 0x150   :  { %710 = vmatprep.subr.bf16.mxu1 %v901_v0 }
 0x153   :  { %711 = vmatpush3.bf16.msra.mxu1 %v758_v57 }
 0x154   :  { %712 = vmatprep.subr.bf16.mxu1 %v901_v0  ;;  %v593_v0 = vld [vmem:[%s1026_s5 + $0x3] ss:$0 sm:$0xff] }
 0x157   :  { %713 = vmatpush3.bf16.msra.mxu1 %v759_v58 }
 0x1fa   :  { %v312_v41 = vpop.f32.mrf.mxu1 }
 0x1fb   :  { %v313_v42 = vadd.f32 %v575_v40, %v312_v41 }
 0x1fc   :  { %v676_v43 = vpop.f32.mrf.mxu1 }
 0x1fd   :  { %v318_v44 = vpack.c.bf16 %v313_v42, %v313_v42 }
 0x1fe   :  { %v315_v45 = vpop.f32.mrf.mxu1 }
 0x1ff   :  { %v319_v46 = vmul.bf16 1056980736, %v318_v44 }
 0x200   :  { %v677_v47 = vpop.f32.mrf.mxu1 }
 0x201   :  { %762 = vtanh.bf16 %v319_v46 }
 0x20f   :  { %v763_v48 = vpop.eup %762 }
 0x210   :  { %v321_v49 = vmul.bf16 1056980736, %v763_v48 }
 0x212   :  { %v322_v50 = vadd.bf16 1056980736, %v321_v49 }
 0x214   :  { %v323_v51 = vmul.bf16 %v322_v50, %v318_v44 }
 0x216   :  { %695 = vmatmul.mubr.bf16.vlgmr.msra.gmra.mxu0 %v323_v51 }
 0x2d6   :  { %v427_v60 = vpop.f32.mrf.mxu0 }
 0x2d7   :  { %v428_v61 = vadd.f32 %v584_v59, %v427_v60 }
 0x2d8   :  { %v696_v62 = vpop.f32.mrf.mxu0 }
 0x2d9   :  { %v433_v63 = vpack.c.bf16 %v428_v61, %v428_v61 }
 0x2da   :  { %v430_v1 = vpop.f32.mrf.mxu0 }
 0x2db   :  { %v434_v2 = vmul.bf16 1056980736, %v433_v63 }
 0x2dc   :  { %v697_v3 = vpop.f32.mrf.mxu0 }
 0x2dd   :  { %764 = vtanh.bf16 %v434_v2 }
 0x2eb   :  { %v765_v4 = vpop.eup %764 }
 0x2ec   :  { %v436_v5 = vmul.bf16 1056980736, %v765_v4 }
 0x2ee   :  { %v437_v6 = vadd.bf16 1056980736, %v436_v5 }
 0x2f0   :  { %v438_v7 = vmul.bf16 %v437_v6, %v433_v63 }
 0x2f2   :  { %715 = vmatmul.mubr.bf16.vlgmr.msra.gmra.mxu1 %v438_v7 }
 0x3b2   :  { %v542_v8 = vpop.f32.mrf.mxu1 }
 0x3b3   :  { %v543_v9 = vadd.f32 %v593_v0, %v542_v8 }
 0x3b4   :  { %v716_v10 = vpop.f32.mrf.mxu1 }
 0x3b5   :  { %548 = vst [vmem:[#allocation11] sm:$0xff] %v543_v9 }
 0x3b6   :  { %v545_v11 = vpop.f32.mrf.mxu1 }
 0x3b7   :  { %877 = shalt.err (!%p874_p1)
}
 0x3b8   :  { %558 = dma.vmem_to_hbm [thread:$0]  %s556_s28, 128, %s1027_s6, [#allocation4]   ;;  %v717_v12 = vpop.f32.mrf.mxu1 }
 0x3b9   :  { %892 = dma.done.wait [#allocation4], 128  }
 0x3ba   :  { %893 = vsyncadd [#allocation4], 4294967168 }
 0x3bb   :  { %562 = vsyncpa [#allocation3], 1 }
 0x3bc   :  { %563 = vsyncpa [#allocation6], 1 }
 0x3bd   :  { %564 = vsyncpa [#allocation9], 1 }
 0x3be   :  { %565 = vsyncpa [#allocation4], 1 }

</bundles_post_ra>
